<compile_context>
chip_gen: v5e
topology: v5e:2x2
jax: 0.10.0
libtpu: 0.0.40
codegen_flags: <defaults>
</compile_context>

<pallas_src>
import functools

import jax
import jax.numpy as jnp
from jax import lax
from jax.experimental import pallas as pl
from jax.experimental.pallas import tpu as pltpu


def _round_up(x, m):
    return ((x + m - 1) // m) * m


def _vmem_params():
    """(working-set budget, scoped vmem limit) in bytes, per TPU generation."""
    phys = 64 * 1024 * 1024
    try:
        info = pltpu.get_tpu_info()
        phys = int(getattr(info, "vmem_capacity_bytes", phys) or phys)
    except Exception:
        pass
    if phys >= 100 * 1024 * 1024:                 # v5e / v6e: 128 MiB physical VMEM
        return 48 * 1024 * 1024, 96 * 1024 * 1024
    return 24 * 1024 * 1024, 32 * 1024 * 1024     # v7x: 64 MiB per TensorCore


# ---------------------------------------------------------------------------
# Kernels: one row tile (block_rows x N) of the *unpadded* score matrix per grid step.
# Only the last row tile can be ragged; its trailing rows contain garbage that is masked
# on (block_rows, 1) vectors after the lane reductions (never on the full tile).
# ---------------------------------------------------------------------------
def _triplet_sum_kernel(margin_ref, scores_ref, dcol_ref, drow_ref, psum_ref, *, block_rows, n):
    i = pl.program_id(0)
    margin = margin_ref[0, 0]
    s = scores_ref[...].astype(jnp.float32)        # (TM, N), cast in-kernel
    d1 = dcol_ref[...]                             # (TM, 1)  diagonal for this tile's rows
    d2 = drow_ref[...]                             # (1, N)   full diagonal as a row

    # Unmasked hinge costs; the diagonal's contribution is corrected with a scalar below.
    t = s + margin
    c = jnp.maximum(t - d1, 0.0) + jnp.maximum(t - d2, 0.0)

    # Reduce lanes first (XLU), then zero the ragged-edge rows on the tiny (TM, 1) vector.
    row_sums = jnp.sum(c, axis=1, keepdims=True)                               # (TM, 1)
    row_idx = lax.broadcasted_iota(jnp.int32, (block_rows, 1), 0) + i * block_rows
    row_sums = jnp.where(row_idx < n, row_sums, 0.0)

    # Each real diagonal element contributed exactly max(margin, 0) to each cost matrix.
    diag_count = jnp.minimum(n - i * block_rows, block_rows).astype(jnp.float32)
    total = jnp.sum(row_sums) - 2.0 * jnp.maximum(margin, 0.0) * diag_count
    psum_ref[...] = total.reshape(1, 1, 1)


def _triplet_max_kernel(margin_ref, scores_ref, dcol_ref, psum_ref, pcolmax_ref, *, block_rows, n):
    i = pl.program_id(0)
    margin = margin_ref[0, 0]
    s = scores_ref[...].astype(jnp.float32)        # (TM, N)
    d1 = dcol_ref[...]                             # (TM, 1)

    # Single full-tile iota (columns); row indices live in a tiny (TM, 1) column vector.
    cols = lax.broadcasted_iota(jnp.int32, s.shape, 1)
    row_idx = lax.broadcasted_iota(jnp.int32, (block_rows, 1), 0) + i * block_rows
    drop = (cols == row_idx) | (row_idx >= n)      # diagonal + ragged-edge rows
    s_masked = jnp.where(drop, -jnp.inf, s)

    # Hardest negative caption per image: row max of masked raw scores, hinge on the vector.
    rowmax = jnp.max(s_masked, axis=1, keepdims=True)                          # (TM, 1)
    row_cost = jnp.maximum(margin + rowmax - d1, 0.0)
    row_cost = jnp.where(row_idx < n, row_cost, 0.0)                           # kill garbage rows
    psum_ref[...] = jnp.sum(row_cost).reshape(1, 1, 1)

    # Per-tile column max of masked raw scores; combined across tiles in a tiny JAX epilogue.
    pcolmax_ref[...] = jnp.max(s_masked, axis=0, keepdims=True).reshape(1, 1, -1)


# ---------------------------------------------------------------------------
# Wrapper
# ---------------------------------------------------------------------------
def triplet_loss(scores, *, margin=0.0, max_violation=False, block_rows=None):
    """Pallas TPU implementation of TripletLoss.forward(scores)."""
    assert scores.ndim == 2 and scores.shape[0] == scores.shape[1]
    n = scores.shape[0]
    if not jnp.issubdtype(scores.dtype, jnp.floating):
        scores = scores.astype(jnp.float32)
    margin = float(margin)
    itemsize = jnp.dtype(scores.dtype).itemsize

    budget, vmem_limit = _vmem_params()

    if n < 8:
        block_rows = n                              # full-extent block waives the (8, .) rule
    else:
        max_rows = max(8, (n // 8) * 8)             # never let a block exceed the array
        if block_rows is None:
            # ~honest per-row footprint: double-buffered native input + ~6 f32 full-tile temps.
            per_row = n * (2 * itemsize + 6 * 4)
            block_rows = min(1024, max(8, budget // per_row))
            if n >= 16:
                # >= 2 grid steps so the "parallel" axis shards across both v7x TensorCores.
                block_rows = min(block_rows, _round_up((n + 1) // 2, 8))
        block_rows = max(8, (int(block_rows) // 8) * 8)
        block_rows = min(block_rows, max_rows)

    num_tiles = -(-n // block_rows)

    diag = jnp.diagonal(scores).astype(jnp.float32)
    dcol = diag.reshape(n, 1)
    drow = diag.reshape(1, n)
    margin_arr = jnp.full((1, 1), margin, dtype=jnp.float32)

    cparams = pltpu.CompilerParams(
        dimension_semantics=("parallel",),          # row tiles are fully independent
        vmem_limit_bytes=vmem_limit,
    )
    cost = pl.CostEstimate(
        flops=6 * n * n,
        transcendentals=0,
        bytes_accessed=n * n * itemsize + 4 * n * 4,
    )
    smem_spec = pl.BlockSpec(memory_space=pltpu.MemorySpace.SMEM)

    if max_violation:
        kernel = functools.partial(_triplet_max_kernel, block_rows=block_rows, n=n)
        psum, pcolmax = pl.pallas_call(
            kernel,
            out_shape=(
                jax.ShapeDtypeStruct((num_tiles, 1, 1), jnp.float32),
                jax.ShapeDtypeStruct((num_tiles, 1, n), jnp.float32),
            ),
            grid=(num_tiles,),
            in_specs=[
                smem_spec,
                pl.BlockSpec((block_rows, n), lambda i: (i, 0)),
                pl.BlockSpec((block_rows, 1), lambda i: (i, 0)),
            ],
            out_specs=(
                pl.BlockSpec((1, 1, 1), lambda i: (i, 0, 0)),
                pl.BlockSpec((1, 1, n), lambda i: (i, 0, 0)),
            ),
            compiler_params=cparams,
            cost_estimate=cost,
        )(margin_arr, scores, dcol)
        # Tiny epilogue in plain JAX: global column max -> hinge -> sum.
        colmax = jnp.max(pcolmax, axis=(0, 1))                   # (N,)
        col_cost = jnp.maximum(margin + colmax - diag, 0.0)
        return jnp.sum(psum) + jnp.sum(col_cost)

    kernel = functools.partial(_triplet_sum_kernel, block_rows=block_rows, n=n)
    psum = pl.pallas_call(
        kernel,
        out_shape=jax.ShapeDtypeStruct((num_tiles, 1, 1), jnp.float32),
        grid=(num_tiles,),
        in_specs=[
            smem_spec,
            pl.BlockSpec((block_rows, n), lambda i: (i, 0)),
            pl.BlockSpec((block_rows, 1), lambda i: (i, 0)),
            pl.BlockSpec((1, n), lambda i: (0, 0)),
        ],
        out_specs=pl.BlockSpec((1, 1, 1), lambda i: (i, 0, 0)),
        compiler_params=cparams,
        cost_estimate=cost,
    )(margin_arr, scores, dcol, drow)
    return jnp.sum(psum)


# ---------------------------------------------------------------------------
# Pure-JAX reference (mirrors the PyTorch module)
# ---------------------------------------------------------------------------
def _reference_triplet_loss(scores, margin=0.0, max_violation=False):
    scores = scores.astype(jnp.float32)
    n = scores.shape[0]
    diag = jnp.diagonal(scores).reshape(n, 1)
    cost_s = jnp.maximum(margin + scores - diag, 0.0)
    cost_im = jnp.maximum(margin + scores - diag.T, 0.0)
    eye = jnp.eye(n, dtype=bool)
    cost_s = jnp.where(eye, 0.0, cost_s)
    cost_im = jnp.where(eye, 0.0, cost_im)
    if max_violation:
        return jnp.sum(jnp.max(cost_s, axis=1)) + jnp.sum(jnp.max(cost_im, axis=0))
    return jnp.sum(cost_s) + jnp.sum(cost_im)


if __name__ == "__main__":
    k1, k2, k3 = jax.random.split(jax.random.PRNGKey(0), 3)
    ok = True

    # Small batch of (image, caption) pairs -> 8 x 8 similarity matrix, f32, single tile.
    n1 = 8
    s1 = jax.random.normal(k1, (n1, n1), dtype=jnp.float32)
    for margin, max_violation in [(0.0, False), (0.2, False), (0.2, True)]:
        out = jax.block_until_ready(triplet_loss(s1, margin=margin, max_violation=max_violation))
        ref = _reference_triplet_loss(s1, margin=margin, max_violation=max_violation)
        if not jnp.allclose(out, ref, rtol=1e-5, atol=1e-5):
            ok = False
            print(f"MISMATCH n={n1} margin={margin} mv={max_violation}: {out} vs {ref}")

    # Ragged-edge path: N=37 (not a multiple of 8), auto block_rows -> 2 tiles, last tile has
    # garbage rows that must be masked in-kernel.
    n2 = 37
    s2 = jax.random.normal(k2, (n2, n2), dtype=jnp.float32)
    for margin, max_violation in [(0.2, False), (0.2, True), (-0.1, False)]:
        out = jax.block_until_ready(triplet_loss(s2, margin=margin, max_violation=max_violation))
        ref = _reference_triplet_loss(s2, margin=margin, max_violation=max_violation)
        if not jnp.allclose(out, ref, rtol=1e-5, atol=1e-4):
            ok = False
            print(f"MISMATCH n={n2} margin={margin} mv={max_violation}: {out} vs {ref}")

    # Multi-tile + bf16 native-dtype DMA path: 3 grid steps of a (16, 40) tile, no padding.
    n3 = 40
    s3 = jax.random.normal(k3, (n3, n3), dtype=jnp.float32).astype(jnp.bfloat16)
    for margin, max_violation in [(0.2, False), (0.2, True)]:
        out = jax.block_until_ready(
            triplet_loss(s3, margin=margin, max_violation=max_violation, block_rows=16))
        ref = _reference_triplet_loss(s3, margin=margin, max_violation=max_violation)
        if not jnp.allclose(out, ref, rtol=1e-4, atol=1e-3):
            ok = False
            print(f"MISMATCH n={n3} margin={margin} mv={max_violation}: {out} vs {ref}")

    if ok:
        print("KERNEL_OK")
</pallas_src>

<mosaic_0001>
module attributes {stable_mosaic.version = 11 : i64} {
  func.func @_triplet_sum_kernel(%arg0: i32, %arg1: memref<1x1xf32, #tpu.memory_space<smem>>, %arg2: memref<8x8xf32, #tpu.memory_space<vmem>>, %arg3: memref<8x1xf32, #tpu.memory_space<vmem>>, %arg4: memref<1x8xf32, #tpu.memory_space<vmem>>, %arg5: memref<1x1x1xf32, #tpu.memory_space<vmem>>) attributes {dimension_semantics = [#tpu.dimension_semantics<parallel>], iteration_bounds = array<i64: 1>, scalar_prefetch = 0 : i64, scratch_operands = 0 : i64, tpu.core_type = #tpu.core_type<tc>, window_params = [{transform_indices = @transform_0, window_bounds = array<i64: 1, 1>}, {transform_indices = @transform_1, window_bounds = array<i64: 8, 8>}, {transform_indices = @transform_2, window_bounds = array<i64: 8, 1>}, {pipeline_mode = #tpu.pipeline_mode<synchronous>, transform_indices = @transform_3, window_bounds = array<i64: 1, 8>}, {transform_indices = @transform_4, window_bounds = array<i64: 1, 1, 1>}]} {
    %c0 = arith.constant 0 : index
    %c0_0 = arith.constant 0 : index
    %0 = memref.load %arg1[%c0, %c0_0] : memref<1x1xf32, #tpu.memory_space<smem>>
    %c0_1 = arith.constant 0 : index
    %c0_2 = arith.constant 0 : index
    %1 = vector.load %arg2[%c0_1, %c0_2] : memref<8x8xf32, #tpu.memory_space<vmem>>, vector<8x8xf32>
    %c0_3 = arith.constant 0 : index
    %c0_4 = arith.constant 0 : index
    %2 = vector.load %arg3[%c0_3, %c0_4] : memref<8x1xf32, #tpu.memory_space<vmem>>, vector<8x1xf32>
    %c0_5 = arith.constant 0 : index
    %c0_6 = arith.constant 0 : index
    %3 = vector.load %arg4[%c0_5, %c0_6] : memref<1x8xf32, #tpu.memory_space<vmem>>, vector<1x8xf32>
    %4 = vector.broadcast %0 : f32 to vector<8x8xf32>
    %5 = arith.addf %1, %4 : vector<8x8xf32>
    %6 = vector.broadcast %2 : vector<8x1xf32> to vector<8x8xf32>
    %7 = arith.subf %5, %6 : vector<8x8xf32>
    %cst = arith.constant 0.000000e+00 : f32
    %8 = vector.broadcast %cst : f32 to vector<8x8xf32>
    %9 = arith.maximumf %7, %8 : vector<8x8xf32>
    %10 = vector.broadcast %3 : vector<1x8xf32> to vector<8x8xf32>
    %11 = arith.subf %5, %10 : vector<8x8xf32>
    %cst_7 = arith.constant 0.000000e+00 : f32
    %12 = vector.broadcast %cst_7 : f32 to vector<8x8xf32>
    %13 = arith.maximumf %11, %12 : vector<8x8xf32>
    %14 = arith.addf %9, %13 : vector<8x8xf32>
    %cst_8 = arith.constant dense<0.000000e+00> : vector<8xf32>
    %15 = vector.multi_reduction <add>, %14, %cst_8 [1] : vector<8x8xf32> to vector<8xf32>
    %16 = vector.shape_cast %15 : vector<8xf32> to vector<8x1xf32>
    %17 = tpu.iota {dimensions = array<i32: 0>} : vector<8x1xi32>
    %c8_i32 = arith.constant 8 : i32
    %18 = arith.muli %arg0, %c8_i32 : i32
    %19 = vector.broadcast %18 : i32 to vector<8x1xi32>
    %20 = arith.addi %17, %19 : vector<8x1xi32>
    %c8_i32_9 = arith.constant 8 : i32
    %21 = vector.broadcast %c8_i32_9 : i32 to vector<8x1xi32>
    %22 = arith.cmpi slt, %20, %21 : vector<8x1xi32>
    %cst_10 = arith.constant 0.000000e+00 : f32
    %23 = vector.broadcast %cst_10 : f32 to vector<8x1xf32>
    %24 = arith.select %22, %16, %23 : vector<8x1xi1>, vector<8x1xf32>
    %c8_i32_11 = arith.constant 8 : i32
    %25 = arith.muli %arg0, %c8_i32_11 : i32
    %c8_i32_12 = arith.constant 8 : i32
    %26 = arith.subi %c8_i32_12, %25 : i32
    %c8_i32_13 = arith.constant 8 : i32
    %27 = arith.minsi %26, %c8_i32_13 : i32
    %28 = arith.sitofp %27 : i32 to f32
    %29 = vector.shape_cast %24 : vector<8x1xf32> to vector<1x8x1xf32>
    %cst_14 = arith.constant dense<0.000000e+00> : vector<1xf32>
    %30 = vector.multi_reduction <add>, %29, %cst_14 [1, 2] : vector<1x8x1xf32> to vector<1xf32>
    %31 = vector.shape_cast %30 : vector<1xf32> to vector<1x1x1xf32>
    %32 = vector.extract %31[0, 0, 0] : f32 from vector<1x1x1xf32>
    %cst_15 = arith.constant 0.000000e+00 : f32
    %33 = arith.maximumf %0, %cst_15 : f32
    %cst_16 = arith.constant 2.000000e+00 : f32
    %34 = arith.mulf %cst_16, %33 : f32
    %35 = arith.mulf %34, %28 : f32
    %36 = arith.subf %32, %35 : f32
    %37 = vector.broadcast %36 : f32 to vector<1x1x1xf32>
    %c0_17 = arith.constant 0 : index
    %c0_18 = arith.constant 0 : index
    %c0_19 = arith.constant 0 : index
    %38 = vector.load %arg5[%c0_17, %c0_18, %c0_19] : memref<1x1x1xf32, #tpu.memory_space<vmem>>, vector<1x1x1xf32>
    tpu.vector_store %arg5[%c0_17, %c0_18, %c0_19], %37 {strides = array<i32>} : memref<1x1x1xf32, #tpu.memory_space<vmem>>, vector<1x1x1xf32>,
    return
  }
  func.func @transform_0(%arg0: i32) -> (i32, i32) {
    %c0_i32 = arith.constant 0 : i32
    %c0_i32_0 = arith.constant 0 : i32
    %c0_i32_1 = arith.constant 0 : i32
    return %c0_i32, %c0_i32_0 : i32, i32
  }
  func.func @transform_1(%arg0: i32) -> (i32, i32) {
    %c0_i32 = arith.constant 0 : i32
    %c0_i32_0 = arith.constant 0 : i32
    return %arg0, %c0_i32 : i32, i32
  }
  func.func @transform_2(%arg0: i32) -> (i32, i32) {
    %c0_i32 = arith.constant 0 : i32
    %c0_i32_0 = arith.constant 0 : i32
    return %arg0, %c0_i32 : i32, i32
  }
  func.func @transform_3(%arg0: i32) -> (i32, i32) {
    %c0_i32 = arith.constant 0 : i32
    %c0_i32_0 = arith.constant 0 : i32
    %c0_i32_1 = arith.constant 0 : i32
    return %c0_i32, %c0_i32_0 : i32, i32
  }
  func.func @transform_4(%arg0: i32) -> (i32, i32, i32) {
    %c0_i32 = arith.constant 0 : i32
    %c0_i32_0 = arith.constant 0 : i32
    %c0_i32_1 = arith.constant 0 : i32
    return %arg0, %c0_i32, %c0_i32_0 : i32, i32, i32
  }
}

</mosaic_0001>

<bundles_post_ra>
// kernel: tpu_custom_call.1
= control target key start
LH: loop header
LB: loop body
LE: loop exit
PB: predicated region body
PF: predicated region fallthrough
CT: control target
= control target key end

     0   :  { %v120_v1 = vmov 0   ;;  %s166_s0 = inlined_call_operand.<no memory space> [shape: f32[1,1], index: 0, kind: input, shape index: {}]   ;;  %s167_s1 = inlined_call_operand.vmem [shape: f32[8,8], index: 1, kind: input, shape index: {}]   ;;  %s168_s2 = inlined_call_operand.vmem [shape: f32[8,1], index: 2, kind: input, shape index: {}]   ;;  %s169_s3 = inlined_call_operand.vmem [shape: f32[1,8], index: 3, kind: input, shape index: {}]   ;;  %s170_s4 = inlined_call_operand.hbm [shape: f32[1,1,1], index: 4, kind: output, shape index: {}]  }
   0x1   :  { %v21_v0 = vld [vmem:[%s168_s2] sm:$0xff]  ;;  %92 = vset.pattern.permute.xlu0 %v120_v1 }
   0x2   :  { %10 = vsyncpa [#allocation4], 0  ;;  %27 = vperm.xlu0 %92, %v21_v0   ;;  %v23_v2 = vstv %s166_s0  ;;  %v20_v3 = vld [vmem:[%s167_s1] sm:$0xff]  ;;  %vm38_vm0 = vcmask 64512   ;;  %vm53_vm1 = vcmask 7168   ;;  %s121_s1 = smov 0.0  }
   0x3   :  { %v93_v4 = vld [vmem:[%s169_s3] ss:$0 sm:$0xff]  ;;  %v24_v5 = vadd.f32 %v23_v2, %v20_v3  ;;  %s64_s23 = smax.f32 %s121_s1, %s166_s0  ;;  %s122_s26 = smov [#allocation3]   ;;  %vm69_vm2 = vcmask 0  }
   0x4   :  { %s65_s24 = smul.f32 2.0, %s64_s23  ;;  %s76_s27 = sshll.u32 %s122_s26, 4  ;;  %s77_s27 = int_to_ptr.vmem [resolvable:$true] %s76_s27 }
   0x5   :  { %v35_v6 = vsub.f32 %v24_v5, %v93_v4  ;;  %s78_s30 = sshll.u32 %s170_s4, 4  ;;  %s79_s30 = int_to_ptr.hbm [resolvable:$true] %s78_s30 }
   0x6   :  { %s66_s25 = smul.f32 8.0, %s65_s24 }
   0x7   :  { %v36_v9 = vmax.f32 %v35_v6, 0.0 }
  0x74   :  { %v28_v7 = vpop.permute.xlu0 %27 }
  0x75   :  { %v30_v8 = vsub.f32 %v24_v5, %v28_v7 }
  0x77   :  { %v31_v10 = vmax.f32 %v30_v8, 0.0 }
  0x79   :  { %v37_v11 = vadd.f32 %v36_v9, %v31_v10 }
  0x7b   :  { %v39_v12 = vsel %vm38_vm0, %v37_v11, 0.0 }
  0x7c   :  { %40 = vadd.xlane.f32.xlu0 %v39_v12 }
  0xef   :  { %v41_v13 = vpop.xlane.xlu0 %40 }
  0xf0   :  { %v54_v14 = vsel %vm53_vm1, %v41_v13, 0.0 }
  0xf1   :  { %55 = vadd.xlane.f32.xlu1 %v54_v14 }
 0x164   :  { %v56_v15 = vpop.xlane.xlu1 %55 }
 0x165   :  { %v57_v16 = vrot.slane %v56_v15, 4 }
 0x167   :  { %v58_v17 = vadd.f32 %v57_v16, %v56_v15 }
 0x169   :  { %v59_v18 = vrot.slane %v58_v17, 2 }
 0x16b   :  { %v60_v19 = vadd.f32 %v59_v18, %v58_v17 }
 0x16d   :  { %v61_v20 = vrot.slane %v60_v19, 1 }
 0x16f   :  { %v62_v21 = vadd.f32 %v61_v20, %v60_v19 }
 0x171   :  { %87 = vpush %v62_v21 }
 0x1a2   :  { %s88_s5 = spop %87 }
 0x1a3   :  { %s67_s6 = ssub.f32 %s88_s5, %s66_s25 }
 0x1a5   :  { %v68_v22 = vstv %s67_s6 }
 0x1a6   :  { %70 = vst.msk [vmem:[#allocation3] sm:$0x1] %vm69_vm2, %v68_v22 }
 0x1a7   :  { %81 = dma.vmem_to_hbm [thread:$0]  %s77_s27, 16, %s79_s30, [#allocation4]  }
 0x1a8   :  { %118 = dma.done.wait [#allocation4], 16  }
 0x1a9   :  { %119 = vsyncadd [#allocation4], 4294967280 }
 0x1aa   :  { %86 = vsyncpa [#allocation4], 1 }

</bundles_post_ra>
